<compile_context>
chip_gen: v7x
topology: tpu7x:2x2x1
jax: 0.10.0
libtpu: 0.0.40
codegen_flags: <defaults>
</compile_context>

<pallas_src>
import math

import jax
import jax.numpy as jnp
from jax import lax
from jax.experimental import pallas as pl
from jax.experimental.pallas import tpu as pltpu


def _sdpa_kernel(q_ref, k_ref, v_ref, ctx_ref, att_ref, *, scale):
    # q_ref/ctx_ref: (1, TQ, D); k_ref/v_ref: (1, L, D); att_ref: (1, TQ, L)
    q = q_ref[0]                                   # (TQ, D)
    k = k_ref[0]                                   # (L, D)
    v = v_ref[0]                                   # (L, D)

    inv_scale = 1.0 / scale
    # score = (Q / scale) @ K^T  -> (TQ, L); NT matmul on the MXU, f32 accumulate.
    score = lax.dot_general(
        q * inv_scale, k,
        dimension_numbers=(((1,), (1,)), ((), ())),
        preferred_element_type=jnp.float32,
    )

    # Numerically stable softmax over the key axis.
    m = jnp.max(score, axis=-1, keepdims=True)
    p = jnp.exp(score - m)
    denom = jnp.sum(p, axis=-1, keepdims=True)
    # Exact reciprocal keeps the result bit-close to the f32 reference;
    # switch to approx=True (EUP) if reference-level accuracy is not required.
    att = p * pl.reciprocal(denom, approx=False)

    # context = att @ V  -> (TQ, D)
    ctx = jnp.dot(att.astype(v.dtype), v, preferred_element_type=jnp.float32)

    ctx_ref[0] = ctx.astype(ctx_ref.dtype)
    att_ref[0] = att.astype(att_ref.dtype)


def _pick_tq(L):
    # Prefer 256-row Q tiles (fills the 256-wide MXU on v6e/v7x), fall back to
    # 128 (v5e MXU width), else take the whole (small / irregular) length.
    for t in (256, 128):
        if L % t == 0:
            return t
    return L


def scaled_dot_product_attention(Q, K, V, scale):
    """Q, K, V: (B, H, L, D).  Returns (context (B,H,L,D), att (B,H,L,L))."""
    B, H, L, D = Q.shape
    assert K.shape == (B, H, L, D) and V.shape == (B, H, L, D)
    BH = B * H

    # Fuse batch and head into one grid axis (pure layout collapse, no copy).
    q3 = Q.reshape(BH, L, D)
    k3 = K.reshape(BH, L, D)
    v3 = V.reshape(BH, L, D)

    TQ = _pick_tq(L)
    n_q_tiles = L // TQ

    kernel = lambda q, k, v, c, a: _sdpa_kernel(q, k, v, c, a, scale=scale)

    q_spec = pl.BlockSpec((1, TQ, D), lambda g, i: (g, i, 0))
    kv_spec = pl.BlockSpec((1, L, D), lambda g, i: (g, 0, 0))
    ctx_spec = pl.BlockSpec((1, TQ, D), lambda g, i: (g, i, 0))
    att_spec = pl.BlockSpec((1, TQ, L), lambda g, i: (g, i, 0))

    # VMEM budget estimate: double-buffered in/out blocks + f32 temporaries.
    itemsize = jnp.dtype(Q.dtype).itemsize
    est = (
        2 * (TQ * D + 2 * L * D + TQ * D + TQ * L) * itemsize  # pipelined blocks
        + 4 * TQ * L * 4                                        # score/exp/att f32 temps
    )
    vmem_limit = int(min(max(2 * est, 32 * 1024 * 1024), 64 * 1024 * 1024))

    context3, att3 = pl.pallas_call(
        kernel,
        out_shape=(
            jax.ShapeDtypeStruct((BH, L, D), Q.dtype),
            jax.ShapeDtypeStruct((BH, L, L), jnp.float32),
        ),
        grid_spec=pltpu.PrefetchScalarGridSpec(
            num_scalar_prefetch=0,
            grid=(BH, n_q_tiles),
            in_specs=[q_spec, kv_spec, kv_spec],
            out_specs=[ctx_spec, att_spec],
        ),
        compiler_params=pltpu.CompilerParams(
            dimension_semantics=("parallel", "parallel"),
            vmem_limit_bytes=vmem_limit,
        ),
    )(q3, k3, v3)

    return context3.reshape(B, H, L, D), att3.reshape(B, H, L, L)


def _reference(Q, K, V, scale):
    score = jnp.matmul(Q / scale, jnp.swapaxes(K, 2, 3))
    att = jax.nn.softmax(score, axis=-1)
    context = jnp.matmul(att, V)
    return context, att


if __name__ == "__main__":
    B, H, L, D = 2, 4, 8, 32
    scale = math.sqrt(D)

    key = jax.random.PRNGKey(0)
    kq, kk, kv = jax.random.split(key, 3)
    Q = jax.random.normal(kq, (B, H, L, D), dtype=jnp.float32)
    K = jax.random.normal(kk, (B, H, L, D), dtype=jnp.float32)
    V = jax.random.normal(kv, (B, H, L, D), dtype=jnp.float32)

    context, att = scaled_dot_product_attention(Q, K, V, scale)
    jax.block_until_ready((context, att))

    ref_ctx, ref_att = _reference(Q, K, V, scale)
    assert jnp.allclose(context, ref_ctx, atol=1e-5, rtol=1e-5)
    assert jnp.allclose(att, ref_att, atol=1e-5, rtol=1e-5)

    print("KERNEL_OK")
</pallas_src>

<mosaic_0001>
module attributes {stable_mosaic.version = 11 : i64} {
  func.func @_lambda_(%arg0: i32, %arg1: i32, %arg2: memref<1x8x32xf32, #tpu.memory_space<vmem>>, %arg3: memref<1x8x32xf32, #tpu.memory_space<vmem>>, %arg4: memref<1x8x32xf32, #tpu.memory_space<vmem>>, %arg5: memref<1x8x32xf32, #tpu.memory_space<vmem>>, %arg6: memref<1x8x8xf32, #tpu.memory_space<vmem>>) attributes {dimension_semantics = [#tpu.dimension_semantics<parallel>, #tpu.dimension_semantics<parallel>], iteration_bounds = array<i64: 8, 1>, scalar_prefetch = 0 : i64, scratch_operands = 0 : i64, tpu.core_type = #tpu.core_type<tc>, window_params = [{transform_indices = @transform_0, window_bounds = array<i64: 1, 8, 32>}, {transform_indices = @transform_1, window_bounds = array<i64: 1, 8, 32>}, {transform_indices = @transform_2, window_bounds = array<i64: 1, 8, 32>}, {transform_indices = @transform_3, window_bounds = array<i64: 1, 8, 32>}, {transform_indices = @transform_4, window_bounds = array<i64: 1, 8, 8>}]} {
    %c0 = arith.constant 0 : index
    %c0_0 = arith.constant 0 : index
    %c0_1 = arith.constant 0 : index
    %0 = vector.load %arg2[%c0, %c0_0, %c0_1] : memref<1x8x32xf32, #tpu.memory_space<vmem>>, vector<1x8x32xf32>
    %1 = vector.shape_cast %0 : vector<1x8x32xf32> to vector<8x32xf32>
    %c0_2 = arith.constant 0 : index
    %c0_3 = arith.constant 0 : index
    %c0_4 = arith.constant 0 : index
    %2 = vector.load %arg3[%c0_2, %c0_3, %c0_4] : memref<1x8x32xf32, #tpu.memory_space<vmem>>, vector<1x8x32xf32>
    %3 = vector.shape_cast %2 : vector<1x8x32xf32> to vector<8x32xf32>
    %c0_5 = arith.constant 0 : index
    %c0_6 = arith.constant 0 : index
    %c0_7 = arith.constant 0 : index
    %4 = vector.load %arg4[%c0_5, %c0_6, %c0_7] : memref<1x8x32xf32, #tpu.memory_space<vmem>>, vector<1x8x32xf32>
    %5 = vector.shape_cast %4 : vector<1x8x32xf32> to vector<8x32xf32>
    %cst = arith.constant 0.176776692 : f32
    %6 = vector.broadcast %cst : f32 to vector<8x32xf32>
    %7 = arith.mulf %1, %6 : vector<8x32xf32>
    %cst_8 = arith.constant dense<0.000000e+00> : vector<8x8xf32>
    %8 = tpu.matmul %7, %3, %cst_8 {dimension_numbers = #tpu.dot_dimension_numbers<[1], [1], [0], [0], [0, 0, 1, 0], [], []>} : vector<8x32xf32>, vector<8x32xf32>, vector<8x8xf32> -> vector<8x8xf32>
    %cst_9 = arith.constant dense<0xFF800000> : vector<8xf32>
    %9 = vector.multi_reduction <maximumf>, %8, %cst_9 [1] : vector<8x8xf32> to vector<8xf32>
    %10 = vector.shape_cast %9 : vector<8xf32> to vector<8x1xf32>
    %11 = vector.broadcast %10 : vector<8x1xf32> to vector<8x8xf32>
    %12 = arith.subf %8, %11 : vector<8x8xf32>
    %13 = math.exp %12 : vector<8x8xf32>
    %cst_10 = arith.constant dense<0.000000e+00> : vector<8xf32>
    %14 = vector.multi_reduction <add>, %13, %cst_10 [1] : vector<8x8xf32> to vector<8xf32>
    %15 = vector.shape_cast %14 : vector<8xf32> to vector<8x1xf32>
    %16 = tpu.reciprocal %15 : vector<8x1xf32> -> vector<8x1xf32>
    %17 = vector.broadcast %16 : vector<8x1xf32> to vector<8x8xf32>
    %18 = arith.mulf %13, %17 : vector<8x8xf32>
    %cst_11 = arith.constant dense<0.000000e+00> : vector<8x32xf32>
    %19 = tpu.matmul %18, %5, %cst_11 {dimension_numbers = #tpu.dot_dimension_numbers<[1], [0], [0], [1], [0, 0, 1, 1], [], []>} : vector<8x8xf32>, vector<8x32xf32>, vector<8x32xf32> -> vector<8x32xf32>
    %c0_12 = arith.constant 0 : index
    %c0_13 = arith.constant 0 : index
    %c0_14 = arith.constant 0 : index
    %20 = vector.load %arg5[%c0_12, %c0_13, %c0_14] : memref<1x8x32xf32, #tpu.memory_space<vmem>>, vector<1x8x32xf32>
    %21 = vector.shape_cast %20 : vector<1x8x32xf32> to vector<8x32xf32>
    %22 = vector.shape_cast %19 : vector<8x32xf32> to vector<1x8x32xf32>
    tpu.vector_store %arg5[%c0_12, %c0_13, %c0_14], %22 {strides = array<i32>} : memref<1x8x32xf32, #tpu.memory_space<vmem>>, vector<1x8x32xf32>,
    %c0_15 = arith.constant 0 : index
    %c0_16 = arith.constant 0 : index
    %c0_17 = arith.constant 0 : index
    %23 = vector.load %arg6[%c0_15, %c0_16, %c0_17] : memref<1x8x8xf32, #tpu.memory_space<vmem>>, vector<1x8x8xf32>
    %24 = vector.shape_cast %23 : vector<1x8x8xf32> to vector<8x8xf32>
    %25 = vector.shape_cast %18 : vector<8x8xf32> to vector<1x8x8xf32>
    tpu.vector_store %arg6[%c0_15, %c0_16, %c0_17], %25 {strides = array<i32>} : memref<1x8x8xf32, #tpu.memory_space<vmem>>, vector<1x8x8xf32>,
    return
  }
  func.func @transform_0(%arg0: i32, %arg1: i32) -> (i32, i32, i32) {
    %c0_i32 = arith.constant 0 : i32
    %c0_i32_0 = arith.constant 0 : i32
    return %arg0, %arg1, %c0_i32 : i32, i32, i32
  }
  func.func @transform_1(%arg0: i32, %arg1: i32) -> (i32, i32, i32) {
    %c0_i32 = arith.constant 0 : i32
    %c0_i32_0 = arith.constant 0 : i32
    %c0_i32_1 = arith.constant 0 : i32
    return %arg0, %c0_i32, %c0_i32_0 : i32, i32, i32
  }
  func.func @transform_2(%arg0: i32, %arg1: i32) -> (i32, i32, i32) {
    %c0_i32 = arith.constant 0 : i32
    %c0_i32_0 = arith.constant 0 : i32
    %c0_i32_1 = arith.constant 0 : i32
    return %arg0, %c0_i32, %c0_i32_0 : i32, i32, i32
  }
  func.func @transform_3(%arg0: i32, %arg1: i32) -> (i32, i32, i32) {
    %c0_i32 = arith.constant 0 : i32
    %c0_i32_0 = arith.constant 0 : i32
    return %arg0, %arg1, %c0_i32 : i32, i32, i32
  }
  func.func @transform_4(%arg0: i32, %arg1: i32) -> (i32, i32, i32) {
    %c0_i32 = arith.constant 0 : i32
    %c0_i32_0 = arith.constant 0 : i32
    return %arg0, %arg1, %c0_i32 : i32, i32, i32
  }
}

</mosaic_0001>

<bundles_post_ra>
// kernel: tpu_custom_call.1
= control target key start
LH: loop header
LB: loop body
LE: loop exit
PB: predicated region body
PF: predicated region fallthrough
CT: control target
= control target key end

     0   :  { %s1333_s0 = inlined_call_operand.hbm [shape: f32[8,8,32], index: 0, kind: input, shape index: {}]   ;;  %s1334_s1 = inlined_call_operand.hbm [shape: f32[8,8,32], index: 1, kind: input, shape index: {}]   ;;  %s1335_s2 = inlined_call_operand.hbm [shape: f32[8,8,32], index: 2, kind: input, shape index: {}]   ;;  %s1336_s3 = inlined_call_operand.hbm [shape: f32[8,8,32], index: 3, kind: output, shape index: {0}]   ;;  %s1337_s4 = inlined_call_operand.hbm [shape: f32[8,8,8], index: 4, kind: output, shape index: {1}]  }
   0x1   :  { %1345 = sst [smem:[#allocation19_spill]] %s1334_s1 }
   0x2   :  { %10 = vsyncpa [#allocation3], 0 }
   0x3   :  { %12 = vsyncpa [#allocation3 + $0x1], 0 }
   0x4   :  { %13 = vsyncpa [#allocation6], 0 }
   0x5   :  { %15 = vsyncpa [#allocation6 + $0x1], 0 }
   0x6   :  { %16 = vsyncpa [#allocation4], 0 }
   0x7   :  { %18 = vsyncpa [#allocation4 + $0x1], 0 }
   0x8   :  { %19 = vsyncpa [#allocation10], 0 }
   0x9   :  { %21 = vsyncpa [#allocation10 + $0x1], 0  ;;  %s1036_s15 = smov 0   ;;  %s1038_s16 = smov 0  }
   0xa   :  { %s1040_s17 = smov 0   ;;  %s1042_s18 = smov 0  }
   0xb   :  { %s1044_s19 = smov 0   ;;  %s1046_s20 = smov 0  }
   0xc LB: > { %1346 = sst [smem:[#allocation15_spill]] %s998_s19  ;;  %s1067_s21 = sadd.s32 4294967295, %s1002_s20   ;;  %s1002_s20 = sphi %s1046_s20, %s27_s20   ;;  %s998_s19 = sphi %s1044_s19, %s1369_s19   ;;  %s994_s18 = sphi %s1042_s18, %s1368_s18   ;;  %s990_s17 = sphi %s1040_s17, %s1372_s17   ;;  %s986_s16 = sphi %s1038_s16, %s1371_s16   ;;  %s982_s15 = sphi %s1036_s15, %s1370_s15  }
   0xd   : > { %s673_s22 = sadd.s32 4294967294, %s1002_s20   ;;  %s39_s23 = sadd.s32 1, %s998_s19 }
   0xe   : > { %s48_s24 = sadd.s32 1, %s990_s17  ;;  %p41_p0 = scmp.ge.s32.totalorder %s39_s23, 8 }
   0xf   : > { %p55_p1 = scmp.ne.s32.totalorder %s990_s17, %s986_s16  ;;  %p56_p2 = scmp.eq.s32.totalorder %s1002_s20, 0 }
  0x10   : > { %p61_p3 = scmp.ne.s32.totalorder %s986_s16, %s982_s15  ;;  %s1374_s23 = smov (%p41_p0, %s39_s23), 0 }
  0x11   : > { %1347 = sst [smem:[#allocation16_spill]] %s1374_s23  ;;  %p1079_p4 = por %p56_p2, %p55_p1 }
  0x12   : > { %p62_p5 = scmp.eq.s32.totalorder %s1067_s21, 0  ;;  %s43_s26 = ssub.s32 %s998_s19, %s1374_s23 }
  0x13   : > { %p139_p6 = scmp.eq.s32.totalorder %s1067_s21, 7  ;;  %p46_p7 = scmp.eq.s32.totalorder %s43_s26, 0 }
  0x14   : > { %p1087_p8 = por %p62_p5, %p61_p3  ;;  %p145_p10 = scmp.eq.s32.totalorder %s673_s22, 7 }
  0x15   : > { %p1091_p9 = por %p139_p6, %p55_p1  ;;  %p738_p12 = scmp.lt.s32.totalorder %s1002_s20, 8 }
  0x16   : > { %s1349_s27 = scalar_select %p1087_p8, 1, 0 }
  0x17   : > { %s1350_s28 = scalar_select %p1091_p9, 1, 0 }
  0x18   : > { %s1096_s29 = scalar_select %p46_p7, %s990_s17, %s48_s24  }
  0x19   : > { %p1098_p11 = por %p145_p10, %p61_p3  ;;  %s1338_s5 = sand.u32 1, %s990_s17  }
  0x1a   : > { %1351 = sst [smem:[#allocation17_spill]] %s1096_s29  ;;  %s1106_s6 = sshll.u32 %s1338_s5, 3 }
  0x1b   : > { %s1352_s30 = scalar_select %p1098_p11, 1, 0 }
  0x1c   : > { %s1109_s7 = sshll.u32 %s998_s19, 7  ;;  %p1113_p13 = pnand %p738_p12, %p1079_p4 }
  0x1d   : > { %1353 = sst [smem:[#allocation18_spill]] %s1352_s30  ;;  %s212_s9 = sand.u32 1, %s1002_s20  }
  0x1e   : > { %s1354_s8 = scalar_select %p1113_p13, 1, 0 }
  0x1f   : > { %s1355_s1 = sld [smem:[#allocation19_spill]]  ;;  %s216_s13 = scalar_lea.vmem [#allocation5], %s1106_s6 }
  0x20   : > { %s223_s14 = sshll.u32 %s216_s13, 4  ;;  %s1129_s22 = scalar_lea.sflag [#allocation6], %s212_s9  ;;  %s1126_s14 = int_to_ptr.vmem [resolvable:$true] %s223_s14 }
  0x21   : > { %p1135_p3 = pneg %p1113_p13 }
  0x25   : > { %s1122_s12 = scalar_lea.hbm %s1355_s1, %s1109_s7  ;;  %s799_s11 = scalar_lea.hbm %s1355_s1, 1024 }
  0x26   : > { %s794_s24 = scalar_lea.hbm %s1122_s12, 128  ;;  %p800_p6 = scmp.lt.u32.totalorder %s1122_s12, %s1355_s1 }
  0x27   : > { %p795_p2 = scmp.ne.s32.totalorder %s1122_s12, %s794_s24  ;;  %p801_p7 = scmp.lt.u32.totalorder %s799_s11, %s794_s24 }
  0x28   : > { %p803_p12 = scmp.lt.u32.totalorder %s794_s24, %s1122_s12 }
  0x29   : > { %p797_p4 = pnand %p1135_p3, %p795_p2  ;;  %p802_p10 = por %p801_p7, %p800_p6 }
  0x2b   : > { %p798_p5 = pneg %p797_p4  ;;  %p804_p0 = por %p803_p12, %p802_p10 }
  0x2d   : > { %p805_p1 = pnand %p804_p0, %p798_p5 }
  0x2f   : > { %808 = shalt.err (!%p805_p1)
}
  0x30   : > { %s809_s9 = scalar_lea.vmem %s1126_s14, 128  ;;  %s1004_s26 = smov [#allocation5]  }
  0x31   : > { %p810_p2 = scmp.ne.s32.totalorder %s1126_s14, %s809_s9  ;;  %s814_s10 = sshll.u32 %s1004_s26, 4  ;;  %s815_s10 = int_to_ptr.vmem [resolvable:$false] %s814_s10 }
  0x32   : > { %s816_s5 = scalar_lea.vmem %s815_s10, 256  ;;  %p817_p9 = scmp.lt.s32.totalorder %s1126_s14, %s815_s10 }
  0x33   : > { %p812_p4 = pnand %p810_p2, %p1135_p3  ;;  %p818_p8 = scmp.lt.s32.totalorder %s816_s5, %s809_s9 }
  0x35   : > { %p813_p11 = pneg %p812_p4  ;;  %p819_p6 = por %p818_p8, %p817_p9 }
  0x37   : > { %p820_p7 = pnand %p819_p6, %p813_p11 }
  0x39   : > { %823 = shalt.err (!%p820_p7)
}
  0x3a   : > { %727 = dma.hbm_to_vmem [thread:$0]  (!%p1113_p13), %s1122_s12, 128, %s1126_s14, %s1129_s22  }
  0x3b   : > { %p1357_p0 = scmp.lt.s32.totalorder %s1002_s20, 9  ;;  %p1358_p1 = scmp.ge.s32.totalorder %s1002_s20, 1 }
  0x3c   : > { %s1171_s9 = scalar_lea.hbm %s1333_s0, %s1109_s7  ;;  %s197_s26 = scalar_lea.vmem [#allocation2], %s1106_s6 }
  0x3d   : > { %p1163_p5 = pnand %p1358_p1, %p1357_p0  ;;  %s205_s10 = sshll.u32 %s197_s26, 4  ;;  %s1174_s10 = int_to_ptr.vmem [resolvable:$true] %s205_s10 }
  0x3e   : > { %s1180_s5 = scalar_lea.hbm %s1335_s2, %s1109_s7  ;;  %s1360_s1 = sand.u32 1, %s990_s17  }
  0x3f   : > { %s1359_s24 = scalar_select %p1163_p5, 1, 0 }
  0x40   : > { %s194_s23 = scalar_lea.sflag [#allocation3], %s1360_s1  ;;  %s824_s19 = scalar_lea.hbm %s1171_s9, 128 }
  0x41   : > { %p825_p8 = scmp.ne.s32.totalorder %s1171_s9, %s824_s19  ;;  %s829_s29 = scalar_lea.hbm %s1333_s0, 1024 }
  0x42   : > { %p830_p10 = scmp.lt.u32.totalorder %s1171_s9, %s1333_s0  ;;  %p831_p12 = scmp.lt.u32.totalorder %s829_s29, %s824_s19 }
  0x43   : > { %p827_p9 = pnand %p825_p8, %p1135_p3  ;;  %p833_p4 = scmp.lt.u32.totalorder %s824_s19, %s1171_s9 }
  0x44   : > { %p832_p2 = por %p831_p12, %p830_p10 }
  0x45   : > { %p828_p11 = pneg %p827_p9 }
  0x46   : > { %p834_p6 = por %p833_p4, %p832_p2 }
  0x48   : > { %p835_p7 = pnand %p834_p6, %p828_p11 }
  0x4a   : > { %838 = shalt.err (!%p835_p7)
}
  0x4b   : > { %s839_s1 = scalar_lea.vmem %s1174_s10, 128  ;;  %s1005_s7 = smov [#allocation2]  }
  0x4c   : > { %p840_p0 = scmp.ne.s32.totalorder %s1174_s10, %s839_s1  ;;  %s844_s12 = sshll.u32 %s1005_s7, 4  ;;  %s845_s12 = int_to_ptr.vmem [resolvable:$false] %s844_s12 }
  0x4d   : > { %s846_s30 = scalar_lea.vmem %s845_s12, 256  ;;  %p847_p9 = scmp.lt.s32.totalorder %s1174_s10, %s845_s12 }
  0x4e   : > { %p842_p1 = pnand %p840_p0, %p1135_p3  ;;  %p848_p5 = scmp.lt.s32.totalorder %s846_s30, %s839_s1 }
  0x50   : > { %p843_p8 = pneg %p842_p1  ;;  %p849_p10 = por %p848_p5, %p847_p9 }
  0x52   : > { %p850_p12 = pnand %p849_p10, %p843_p8 }
  0x54   : > { %853 = shalt.err (!%p850_p12)
}
  0x55   : > { %724 = dma.hbm_to_vmem [thread:$0]  (!%p1113_p13), %s1171_s9, 128, %s1174_s10, %s194_s23  }
  0x56   : > { %s234_s19 = scalar_lea.vmem [#allocation7], %s1106_s6  ;;  %s854_s14 = scalar_lea.hbm %s1180_s5, 128 }
  0x57   : > { %s241_s29 = sshll.u32 %s234_s19, 4  ;;  %p855_p11 = scmp.ne.s32.totalorder %s1180_s5, %s854_s14  ;;  %s242_s29 = int_to_ptr.vmem [resolvable:$true] %s241_s29 }
  0x58   : > { %s859_s26 = scalar_lea.hbm %s1335_s2, 1024  ;;  %p860_p4 = scmp.lt.u32.totalorder %s1180_s5, %s1335_s2 }
  0x59   : > { %p857_p5 = pnand %p855_p11, %p1135_p3  ;;  %p861_p6 = scmp.lt.u32.totalorder %s859_s26, %s854_s14 }
  0x5a   : > { %p863_p0 = scmp.lt.u32.totalorder %s854_s14, %s1180_s5 }
  0x5b   : > { %p858_p2 = pneg %p857_p5  ;;  %p862_p7 = por %p861_p6, %p860_p4 }
  0x5d   : > { %p864_p1 = por %p863_p0, %p862_p7 }
  0x5f   : > { %p865_p8 = pnand %p864_p1, %p858_p2 }
  0x61   : > { %868 = shalt.err (!%p865_p8)
}
  0x62   : > { %s869_s23 = scalar_lea.vmem %s242_s29, 128  ;;  %s1006_s6 = smov [#allocation7]  }
  0x63   : > { %p870_p9 = scmp.ne.s32.totalorder %s242_s29, %s869_s23  ;;  %s874_s9 = sshll.u32 %s1006_s6, 4  ;;  %s875_s9 = int_to_ptr.vmem [resolvable:$false] %s874_s9 }
  0x64   : > { %s876_s10 = scalar_lea.vmem %s875_s9, 256  ;;  %p877_p11 = scmp.lt.s32.totalorder %s242_s29, %s875_s9 }
  0x65   : > { %p872_p10 = pnand %p870_p9, %p1135_p3  ;;  %p878_p5 = scmp.lt.s32.totalorder %s876_s10, %s869_s23 }
  0x67   : > { %p873_p12 = pneg %p872_p10  ;;  %p879_p13 = por %p878_p5, %p877_p11 }
  0x69   : > { %p880_p4 = pnand %p879_p13, %p873_p12 }
  0x6b   : > { %883 = shalt.err (!%p880_p4)
}
  0x6c   : > { %p1361_p6 = scmp.ne.s32.totalorder %s1354_s8, 0  ;;  %p1362_p2 = scmp.ne.s32.totalorder %s1359_s24, 0 }
  0x6d   : > { %s1227_s25 = sand.u32 (!%p1362_p2), 1, %s986_s16   ;;  %p1363_p13 = scmp.ne.s32.totalorder (!%p1362_p2), %s1349_s27, 0 }
  0x6e   : > { %730 = dma.hbm_to_vmem [thread:$0]  (!%p1361_p6), %s1180_s5, 128, %s242_s29, %s1129_s22  }
  0x6f   : > { %250 = sbr.rel (%p1362_p2) target bundleno = 880 (0x370), region = 32  ;;  %s1230_s12 = sshll.u32 (!%p1362_p2), %s1227_s25, 3 }
  0x70   : > { %s253_s30 = scalar_lea.sflag (!%p1362_p2), [#allocation3], %s1227_s25  ;;  %s256_s19 = scalar_lea.vmem (!%p1362_p2), [#allocation2], %s1230_s12 }
  0x76   : > { %965 = dma.done.wait (%p1363_p13), %s253_s30, 128  }
  0x77   : > { %967 = vsyncadd (%p1363_p13), %s253_s30, 4294967168  ;;  %s261_s8 = sand.u32 1, %s1067_s21   ;;  %s265_s24 = scalar_lea.vmem [#allocation5], %s1230_s12 }
  0x78   : > { %s262_s22 = scalar_lea.sflag [#allocation6], %s261_s8 }
  0x79   : > { %969 = dma.done.wait (%p1363_p13), %s262_s22, 256  }
  0x7a   : > { %971 = vsyncadd (%p1363_p13), %s262_s22, 4294967040  ;;  %v1007_v0 = vmov 0.0   ;;  %vm1008_vm0 = vmmov 0   ;;  %vm318_vm1 = vcmask 261120   ;;  %v315_v1 = vld [vmem:[%s265_s24] sm:$0xff]  ;;  %v314_v2 = vld [vmem:[%s256_s19] sm:$0xff] }
  0x7b   : > { %701 = vmatprep.subr.mxu0 %v1007_v0  ;;  %703 = vmatprep.mubr.msk.f32.mxu0 %vm1008_vm0, %v1007_v0  ;;  %v317_v3 = vmul.f32 0.17677669, %v314_v2  ;;  %vm395_vm2 = vcmask 64512   ;;  %s274_s21 = scalar_lea.vmem [#allocation7], %s1230_s12  ;;  %s313_s27 = scalar_lea.vmem [#allocation9], %s1230_s12 }
  0x7c   : > { %706 = vmatprep.subr.mxu1 %v1007_v0  ;;  %708 = vmatprep.mubr.msk.f32.mxu1 %vm1008_vm0, %v1007_v0  ;;  %v316_v12 = vld [vmem:[%s274_s21] sm:$0xff]  ;;  %s693_s5 = sshll.u32 %s994_s18, 7  ;;  %s516_s13 = sshll.u32 %s313_s27, 4  ;;  %s517_s13 = int_to_ptr.vmem [resolvable:$true] %s516_s13 }
  0x7d   : > { %702 = vmatpush3.xpose.msk.msra.mxu0 %vm318_vm1, %v315_v1  ;;  %707 = vmatpush3.msra.mxu1 %v316_v12  ;;  %s1258_s11 = scalar_lea.hbm %s1337_s4, %s693_s5  ;;  %s488_s26 = scalar_lea.sflag [#allocation10], %s1227_s25 }
  0x7e   : > { %s884_s1 = scalar_lea.vmem %s517_s13, 128  ;;  %p1364_p7 = scmp.ne.s32.totalorder %s1350_s28, 0 }
  0x7f   : > { %p885_p3 = scmp.ne.s32.totalorder %s517_s13, %s884_s1  ;;  %s1009_s7 = smov [#allocation9]  }
  0x80   : > { %704 = vmatmul.mubr.msk.f32.vlgmr.msra.gmra.mrb[0].mxu0 %vm318_vm1, %v317_v3  ;;  %s888_s23 = sshll.u32 %s1009_s7, 4  ;;  %s889_s23 = int_to_ptr.vmem [resolvable:$false] %s888_s23 }
  0x81   : > { %p886_p0 = pnand %p885_p3, %p1364_p7  ;;  %s890_s6 = scalar_lea.vmem %s889_s23, 256 }
  0x82   : > { %p891_p8 = scmp.lt.s32.totalorder %s517_s13, %s889_s23  ;;  %p892_p9 = scmp.lt.s32.totalorder %s890_s6, %s884_s1 }
  0x83   : > { %p887_p1 = pneg %p886_p0 }
  0x84   : > { %p893_p10 = por %p892_p9, %p891_p8 }
  0x86   : > { %p894_p12 = pnand %p893_p10, %p887_p1 }
 0x153   : > { %v391_v4 = vpop.f32.mrb[0].mxu0 }
 0x154   : > { %v705_v5 = vpop.f32.mrb[1].mxu0  ;;  %v396_v6 = vsel %vm395_vm2, %v391_v4, -inf }
 0x155   : > { %397 = vmax.xlane.f32.xlu0 %v396_v6 }
 0x1e2   : > { %v398_v7 = vpop.xlane.xlu0 %397 }
 0x1e3   : > { %v399_v8 = vsub.f32 %v391_v4, %v398_v7 }
 0x1e5   : > { %v400_v9 = vmul.f32 1.442695, %v399_v8 }
 0x1e7   : > { %790 = vpow2.f32 %v400_v9 }
 0x1f1   : > { %v791_v10 = vpop.eup %790 }
 0x1f2   : > { %v402_v11 = vsel %vm395_vm2, %v791_v10, 0.0 }
 0x1f3   : > { %403 = vadd.xlane.f32.xlu0 %v402_v11 }
 0x280   : > { %v404_v13 = vpop.xlane.xlu0 %403 }
 0x281   : > { %792 = vrcp.f32 %v404_v13 }
 0x28b   : > { %v793_v14 = vpop.eup %792 }
 0x28c   : > { %v406_v15 = vmul.f32 %v793_v14, %v791_v10 }
 0x28e   : > { %709 = vmatmul.mubr.msk.f32.vlgmr.msra.gmra.mrb[0].mxu1 %vm395_vm2, %v406_v15  ;;  %481 = vst.msk [vmem:[%s313_s27] sm:$0xff] %vm395_vm2, %v406_v15 }
 0x28f   : > { %897 = shalt.err (!%p894_p12)
}
 0x290   : > { %s898_s9 = scalar_lea.hbm %s1258_s11, 128  ;;  %s902_s19 = scalar_lea.hbm %s1337_s4, 1024 }
 0x291   : > { %p899_p11 = scmp.ne.s32.totalorder %s1258_s11, %s898_s9  ;;  %p903_p6 = scmp.lt.u32.totalorder %s1258_s11, %s1337_s4 }
 0x292   : > { %p904_p2 = scmp.lt.u32.totalorder %s902_s19, %s898_s9  ;;  %p906_p3 = scmp.lt.u32.totalorder %s898_s9, %s1258_s11 }
 0x293   : > { %p900_p5 = pnand %p899_p11, %p1364_p7 }
 0x294   : > { %p905_p13 = por %p904_p2, %p903_p6 }
 0x295   : > { %p901_p4 = pneg %p900_p5 }
 0x296   : > { %p907_p0 = por %p906_p3, %p905_p13 }
 0x298   : > { %p908_p1 = pnand %p907_p0, %p901_p4 }
 0x29a   : > { %911 = shalt.err (!%p908_p1)
}
 0x29b   : > { %718 = dma.vmem_to_hbm [thread:$0]  (%p1364_p7), %s517_s13, 128, %s1258_s11, %s488_s26  }
 0x29c   : > { %s306_s24 = scalar_lea.vmem [#allocation8], %s1230_s12  ;;  %s1284_s14 = scalar_lea.hbm %s1336_s3, %s693_s5 }
 0x29d   : > { %s502_s21 = sshll.u32 %s306_s24, 4  ;;  %s483_s1 = scalar_lea.sflag [#allocation4], %s1227_s25  ;;  %s1286_s21 = int_to_ptr.vmem [resolvable:$true] %s502_s21 }
 0x29e   : > { %s912_s7 = scalar_lea.vmem %s1286_s21, 128  ;;  %s1010_s18 = smov [#allocation8]  }
 0x29f   : > { %p913_p8 = scmp.ne.s32.totalorder %s1286_s21, %s912_s7  ;;  %s916_s12 = sshll.u32 %s1010_s18, 4  ;;  %s917_s12 = int_to_ptr.vmem [resolvable:$false] %s916_s12 }
 0x2a0   : > { %s918_s5 = scalar_lea.vmem %s917_s12, 256  ;;  %p919_p12 = scmp.lt.s32.totalorder %s1286_s21, %s917_s12 }
 0x2a1   : > { %p914_p9 = pnand %p913_p8, %p1364_p7  ;;  %p920_p11 = scmp.lt.s32.totalorder %s918_s5, %s912_s7 }
 0x2a3   : > { %p915_p10 = pneg %p914_p9  ;;  %p921_p5 = por %p920_p11, %p919_p12 }
 0x2a5   : > { %p922_p4 = pnand %p921_p5, %p915_p10 }
 0x361   : > { %v476_v16 = vpop.f32.mrb[0].mxu1 }
 0x362   : > { %480 = vst.msk [vmem:[%s306_s24] sm:$0xff] %vm318_vm1, %v476_v16  ;;  %v710_v17 = vpop.f32.mrb[1].mxu1 }
 0x363   : > { %925 = shalt.err (!%p922_p4)
}
 0x364   : > { %s926_s25 = scalar_lea.hbm %s1284_s14, 128  ;;  %s930_s26 = scalar_lea.hbm %s1336_s3, 1024 }
 0x365   : > { %p927_p6 = scmp.ne.s32.totalorder %s1284_s14, %s926_s25  ;;  %p931_p3 = scmp.lt.u32.totalorder %s1284_s14, %s1336_s3 }
 0x366   : > { %p932_p0 = scmp.lt.u32.totalorder %s930_s26, %s926_s25  ;;  %p934_p8 = scmp.lt.u32.totalorder %s926_s25, %s1284_s14 }
 0x367   : > { %p928_p2 = pnand %p927_p6, %p1364_p7 }
 0x368   : > { %p933_p1 = por %p932_p0, %p931_p3 }
 0x369   : > { %p929_p13 = pneg %p928_p2 }
 0x36a   : > { %p935_p9 = por %p934_p8, %p933_p1 }
 0x36c   : > { %p936_p10 = pnand %p935_p9, %p929_p13 }
 0x36e   : > { %939 = shalt.err (!%p936_p10)
}
 0x36f   : > { %717 = dma.vmem_to_hbm [thread:$0]  (%p1364_p7), %s1286_s21, 128, %s1284_s14, %s483_s1  }
 0x370 PF: > { %s1365_s9 = sld [smem:[#allocation18_spill]]  ;;  %p739_p12 = scmp.ge.s32.totalorder %s1002_s20, 2 }
 0x371   : > { %s528_s10 = sand.u32 1, %s982_s15  }
 0x372   : > { %s529_s30 = scalar_lea.sflag [#allocation4], %s528_s10 }
 0x376   : > { %p1366_p11 = scmp.ne.s32.totalorder %s1365_s9, 0 }
 0x378   : > { %p732_p5 = pnand %p739_p12, %p1366_p11 }
 0x37a   : > { %973 = dma.done.wait (!%p732_p5), %s529_s30, 128  }
 0x37b   : > { %975 = vsyncadd (!%p732_p5), %s529_s30, 4294967168  ;;  %s538_s19 = scalar_lea.sflag [#allocation10], %s528_s10 }
 0x37c   : > { %977 = dma.done.wait (!%p732_p5), %s538_s19, 128  }
 0x37d   : > { %979 = vsyncadd (!%p732_p5), %s538_s19, 4294967168  ;;  %s27_s20 = sadd.s32 1, %s1002_s20   ;;  %s1367_s28 = sld [smem:[#allocation17_spill]] }
 0x37e   : > { %p24_p4 = scmp.ge.s32.totalorder %s27_s20, 10   ;;  %s1368_s18 = sld [smem:[#allocation15_spill]] }
 0x37f   : > { %s1369_s19 = sld [smem:[#allocation16_spill]]  ;;  %s1370_s15 = smov %s986_s16 }
 0x380   : > { %s1371_s16 = smov %s990_s17  ;;  %26 = sbr.rel (!%p24_p4) target bundleno = 12 (0xc), region = 118 }
 0x383   : > { %s1372_s17 = smov %s1367_s28 }
 0x387   :  { %543 = vsyncpa [#allocation3], 1 }
 0x388   :  { %545 = vsyncpa [#allocation3 + $0x1], 1 }
 0x389   :  { %546 = vsyncpa [#allocation6], 1 }
 0x38a   :  { %548 = vsyncpa [#allocation6 + $0x1], 1 }
 0x38b   :  { %549 = vsyncpa [#allocation4], 1 }
 0x38c   :  { %551 = vsyncpa [#allocation4 + $0x1], 1 }
 0x38d   :  { %552 = vsyncpa [#allocation10], 1 }
 0x38e   :  { %554 = vsyncpa [#allocation10 + $0x1], 1 }

</bundles_post_ra>
